<compile_context>
chip_gen: v7x
topology: tpu7x:2x2x1
jax: 0.10.0
libtpu: 0.0.40
codegen_flags: <defaults>
</compile_context>

<pallas_src>
import math
import functools
import numpy as np
import jax
import jax.numpy as jnp
from jax.experimental import pallas as pl
from jax.experimental.pallas import tpu as pltpu

VMEM = pltpu.MemorySpace.VMEM
SMEM = pltpu.MemorySpace.SMEM


def _pad_to(x, shape):
    """Zero-pad `x` up to `shape` (trailing-pad every axis)."""
    pads = [(0, t - s) for s, t in zip(x.shape, shape)]
    if any(p[1] for p in pads):
        return jnp.pad(x, pads)
    return x


# --------------------------------------------------------------------------
# Kernel 1 (one-shot "prelude"):
#   DurationEmbedder (Fourier features + Linear), masked nanmean pooling +
#   fc (Linear+ReLU), and the step-invariant conditioning of the stand-in
#   transformer:  cond = ReLU(pooled @ fc) @ wp + mean(concat(enc, dur)) @ we
#   All fused into a single pallas_call since it runs once per inference.
# --------------------------------------------------------------------------
def _prelude_kernel(dur_ref, posw_ref, wt_ref, ws_ref, wc_ref, db_ref,
                    enc_ref, mask_ref, fcw_ref, fcb_ref, wp_ref, we_ref,
                    cond_ref):
    # --- DurationEmbedder: StableAudioPositionalEmbedding + Linear ---
    t = dur_ref[0]                                       # normalized duration (SMEM scalar)
    freqs = t * posw_ref[...] * (2.0 * math.pi)          # (1, half_dim)
    s = jnp.sin(freqs)
    c = jnp.cos(freqs)
    dur_emb = (t * wt_ref[...]
               + jnp.dot(s, ws_ref[...], preferred_element_type=jnp.float32)
               + jnp.dot(c, wc_ref[...], preferred_element_type=jnp.float32)
               + db_ref[...])                            # (1, D)

    # --- masked nanmean pooling over the text sequence + fc (Linear+ReLU) ---
    enc = enc_ref[...]                                   # (B, L, D)
    mask = mask_ref[...]                                 # (B, L, 1)
    msum = jnp.sum(enc * mask, axis=1)                   # (B, D)
    cnt = jnp.sum(mask, axis=1)                          # (B, 1)  (NaN if empty, as torch.nanmean)
    pooled = msum / cnt
    pooled_proj = jnp.maximum(
        jnp.dot(pooled, fcw_ref[...], preferred_element_type=jnp.float32)
        + fcb_ref[...], 0.0)                             # (B, J)

    # --- step-invariant conditioning for the stand-in transformer ---
    L = enc.shape[1]
    # mean over concat([enc_hidden, dur_emb], axis=1)
    ctx = (jnp.sum(enc, axis=1) + dur_emb) / float(L + 1)   # (B, D)
    cond_ref[...] = (
        jnp.dot(pooled_proj, wp_ref[...], preferred_element_type=jnp.float32)
        + jnp.dot(ctx, we_ref[...], preferred_element_type=jnp.float32))  # (B, Cp)


def compute_cond(norm_dur, pos_w, dur_w, dur_b, enc, mask3, fc_w, fc_b,
                 wp_pad, we_pad):
    half = pos_w.shape[-1]
    w_t = dur_w[0:1, :]
    w_s = dur_w[1:1 + half, :]
    w_c = dur_w[1 + half:, :]
    B = enc.shape[0]
    Cp = wp_pad.shape[-1]
    return pl.pallas_call(
        _prelude_kernel,
        out_shape=jax.ShapeDtypeStruct((B, Cp), jnp.float32),
        in_specs=[pl.BlockSpec(memory_space=SMEM)]        # normalized duration
        + [pl.BlockSpec(memory_space=VMEM)] * 11,
        out_specs=pl.BlockSpec(memory_space=VMEM),
    )(norm_dur, pos_w, w_t, w_s, w_c, dur_b, enc, mask3, fc_w, fc_b,
      wp_pad, we_pad)


# --------------------------------------------------------------------------
# Kernel 2 (fused denoising loop):
#   grid = (num_inference_steps,)
#   Per step: stand-in transformer (conditioned 2-layer MLP velocity field,
#   evaluated for the uncond/text conditioning rows), classifier-free-
#   guidance combine, FlowMatchEuler step.  Latents live in a VMEM-resident
#   output accumulator; weights/cond are VMEM-resident; t/dsigma read from
#   SMEM per step.
# --------------------------------------------------------------------------
def _denoise_kernel(t_ref, ds_ref, lat_in_ref, cond_ref,
                    w1_ref, b1_ref, w2_ref, b2_ref,
                    lat_ref, *, guidance):
    # TODO(synk): the real FluxTransformer2DModel (joint + single MM-DiT
    # blocks, RoPE attention over txt_ids/img_ids) lives in diffusers; here a
    # timestep/pooled/context-conditioned MLP over the latent tokens is used.
    step = pl.program_id(0)

    @pl.when(step == 0)
    def _():
        lat_ref[...] = lat_in_ref[...]            # initialize resident accumulator

    t = t_ref[step]                               # timestep / 1000  (SMEM scalar)
    ds = ds_ref[step]                             # sigma_{i+1} - sigma_i (SMEM scalar)

    lat = lat_ref[0]                              # (S, Cp)
    cond_t = cond_ref[...] + t                    # (2, Cp): [uncond, text] conditioning
    # Evaluate both CFG branches without duplicating the latents in HBM.
    h = jnp.concatenate(
        [lat + cond_t[0:1, :], lat + cond_t[1:2, :]], axis=0)      # (2S, Cp)
    h = jnp.maximum(
        jnp.dot(h, w1_ref[...], preferred_element_type=jnp.float32)
        + b1_ref[...], 0.0)                                        # (2S, Hp)
    o = (jnp.dot(h, w2_ref[...], preferred_element_type=jnp.float32)
         + b2_ref[...])                                            # (2S, Cp)

    S = lat.shape[0]
    o_uncond = o[:S]
    o_text = o[S:]
    # CFG combine + FlowMatchEuler step fused into the epilogue.
    guided = o_uncond + guidance * (o_text - o_uncond)             # (S, Cp)
    lat_ref[0] = lat + ds * guided


def denoise_loop(t_arr, ds_arr, lat0, cond, w1, b1, w2, b2, *,
                 guidance_scale, num_steps):
    _, S, Cp = lat0.shape
    Hp = w1.shape[1]
    B2 = cond.shape[0]
    kernel = functools.partial(_denoise_kernel, guidance=float(guidance_scale))
    return pl.pallas_call(
        kernel,
        out_shape=jax.ShapeDtypeStruct((1, S, Cp), jnp.float32),
        grid_spec=pltpu.PrefetchScalarGridSpec(
            num_scalar_prefetch=0,
            grid=(num_steps,),
            in_specs=[
                pl.BlockSpec(memory_space=SMEM),                      # t_arr
                pl.BlockSpec(memory_space=SMEM),                      # dsigma_arr
                pl.BlockSpec((1, S, Cp), lambda i: (0, 0, 0)),        # initial latents
                pl.BlockSpec((B2, Cp), lambda i: (0, 0)),             # hoisted conditioning
                pl.BlockSpec((Cp, Hp), lambda i: (0, 0)),             # w1 (VMEM-resident)
                pl.BlockSpec((1, Hp), lambda i: (0, 0)),              # b1
                pl.BlockSpec((Hp, Cp), lambda i: (0, 0)),             # w2
                pl.BlockSpec((1, Cp), lambda i: (0, 0)),              # b2
            ],
            out_specs=pl.BlockSpec((1, S, Cp), lambda i: (0, 0, 0)),  # resident accumulator
        ),
        input_output_aliases={2: 0},                                  # in-place latent update
        compiler_params=pltpu.CompilerParams(
            dimension_semantics=("arbitrary",)),
    )(t_arr, ds_arr, lat0, cond, w1, b1, w2, b2)


# --------------------------------------------------------------------------
# TangoFlux forward (inference) driver
# --------------------------------------------------------------------------
def tangoflux_forward(params, enc_hidden, enc_mask, duration,
                      num_inference_steps=4, guidance_scale=3.0,
                      max_duration=30.0, audio_seq_len=8, latent_ch=64,
                      latent_key=None, lane_pad=128):
    # lane-dense padded dims (C=64 / H=64 are below the 128-lane vreg width)
    Cp = max(lane_pad, latent_ch)
    Hp = max(lane_pad, params["w1"].shape[1])

    # --- DurationEmbedder input normalization (scalar host math) ---
    dur = jnp.clip(duration, 0.0, max_duration)
    norm_dur = (dur / max_duration).reshape(1).astype(jnp.float32)

    # --- pad stand-in transformer weights / latent channels to 128 lanes ---
    wp_p = _pad_to(params["wp"], (params["wp"].shape[0], Cp))
    we_p = _pad_to(params["we"], (params["we"].shape[0], Cp))
    w1_p = _pad_to(params["w1"], (Cp, Hp))
    b1_p = _pad_to(params["b1"], (1, Hp))
    w2_p = _pad_to(params["w2"], (Hp, Cp))
    b2_p = _pad_to(params["b2"], (1, Cp))

    mask3 = enc_mask[..., None].astype(jnp.float32)                 # (2, L, 1)

    # --- one-shot prelude: duration embed + masked pooling + fc + cond ---
    cond = compute_cond(norm_dur, params["pos_w"], params["dur_w"],
                        params["dur_b"], enc_hidden, mask3,
                        params["fc_w"], params["fc_b"], wp_p, we_p)  # (2, Cp)

    # --- FlowMatchEulerDiscreteScheduler (shift = 1.0) ---
    sigmas = np.linspace(1.0, 1.0 / num_inference_steps, num_inference_steps)
    sigmas_full = np.concatenate([sigmas, [0.0]])
    t_arr = jnp.asarray(sigmas, dtype=jnp.float32)        # timesteps / 1000 == sigmas
    ds_arr = jnp.asarray(np.diff(sigmas_full), dtype=jnp.float32)

    # --- initial latents (channel dim zero-padded to 128 lanes) ---
    latents = jax.random.normal(latent_key, (1, audio_seq_len, latent_ch),
                                dtype=jnp.float32)
    lat_p = _pad_to(latents, (1, audio_seq_len, Cp))

    # --- fused denoising loop (single pallas_call, grid over steps) ---
    lat_out = denoise_loop(t_arr, ds_arr, lat_p, cond,
                           w1_p, b1_p, w2_p, b2_p,
                           guidance_scale=guidance_scale,
                           num_steps=num_inference_steps)
    return lat_out[:, :, :latent_ch]


if __name__ == "__main__":
    # small synthetic config
    D = 32            # text_embedding_dim (T5 d_model stand-in)
    J = 32            # joint_attention_dim
    L = 8             # text sequence length
    S = 8             # audio_seq_len
    C = 64            # latent channels (hardcoded 64 in the reference)
    INTERNAL = 256    # DurationEmbedder internal_dim
    H = 64            # stand-in transformer hidden dim

    key = jax.random.PRNGKey(0)
    keys = jax.random.split(key, 16)

    params = {
        # StableAudioPositionalEmbedding weights (half_dim,) kept as (1, half_dim)
        "pos_w": jax.random.normal(keys[0], (1, INTERNAL // 2), jnp.float32),
        # Linear(internal_dim + 1 -> D)
        "dur_w": 0.02 * jax.random.normal(keys[1], (INTERNAL + 1, D), jnp.float32),
        "dur_b": 0.02 * jax.random.normal(keys[2], (1, D), jnp.float32),
        # fc: Linear(D -> J) + ReLU
        "fc_w": 0.05 * jax.random.normal(keys[3], (D, J), jnp.float32),
        "fc_b": 0.05 * jax.random.normal(keys[4], (1, J), jnp.float32),
        # stand-in transformer params (f32; TODO(synk): bf16 MXU operands on v6e/v7x)
        "wp": 0.05 * jax.random.normal(keys[5], (J, C), jnp.float32),
        "we": 0.05 * jax.random.normal(keys[6], (D, C), jnp.float32),
        "w1": 0.05 * jax.random.normal(keys[7], (C, H), jnp.float32),
        "b1": 0.05 * jax.random.normal(keys[8], (1, H), jnp.float32),
        "w2": 0.05 * jax.random.normal(keys[9], (H, C), jnp.float32),
        "b2": 0.05 * jax.random.normal(keys[10], (1, C), jnp.float32),
    }

    # TODO(synk): T5EncoderModel / tokenizer not reproducible in-script; use
    # deterministic random embeddings for [negative_prompt, prompt] (CFG batch=2).
    prompt_embeds = jax.random.normal(keys[11], (1, L, D), jnp.float32)
    neg_embeds = jax.random.normal(keys[12], (1, L, D), jnp.float32)
    enc_hidden = jnp.concatenate([neg_embeds, prompt_embeds], axis=0)      # (2, L, D)
    prompt_mask = jnp.array([[1, 1, 1, 1, 1, 1, 0, 0]], dtype=jnp.float32)
    uncond_mask = jnp.array([[1, 1, 0, 0, 0, 0, 0, 0]], dtype=jnp.float32)
    enc_mask = jnp.concatenate([uncond_mask, prompt_mask], axis=0)         # (2, L)

    duration = jnp.array([10.0], dtype=jnp.float32)

    latents = tangoflux_forward(params, enc_hidden, enc_mask, duration,
                                num_inference_steps=4, guidance_scale=3.0,
                                max_duration=30.0, audio_seq_len=S,
                                latent_ch=C, latent_key=keys[13])
    latents = jax.block_until_ready(latents)
    assert latents.shape == (1, S, C)
    assert bool(jnp.all(jnp.isfinite(latents)))
    print("KERNEL_OK")
</pallas_src>

<mosaic_0001>
module attributes {stable_mosaic.version = 11 : i64} {
  func.func @_prelude_kernel(%arg0: memref<1xf32, #tpu.memory_space<smem>>, %arg1: memref<1x128xf32, #tpu.memory_space<vmem>>, %arg2: memref<1x32xf32, #tpu.memory_space<vmem>>, %arg3: memref<128x32xf32, #tpu.memory_space<vmem>>, %arg4: memref<128x32xf32, #tpu.memory_space<vmem>>, %arg5: memref<1x32xf32, #tpu.memory_space<vmem>>, %arg6: memref<2x8x32xf32, #tpu.memory_space<vmem>>, %arg7: memref<2x8x1xf32, #tpu.memory_space<vmem>>, %arg8: memref<32x32xf32, #tpu.memory_space<vmem>>, %arg9: memref<1x32xf32, #tpu.memory_space<vmem>>, %arg10: memref<32x128xf32, #tpu.memory_space<vmem>>, %arg11: memref<32x128xf32, #tpu.memory_space<vmem>>, %arg12: memref<2x128xf32, #tpu.memory_space<vmem>>) attributes {dimension_semantics = [], scalar_prefetch = 0 : i64, scratch_operands = 0 : i64, tpu.core_type = #tpu.core_type<tc>} {
    %c0 = arith.constant 0 : index
    %0 = memref.load %arg0[%c0] : memref<1xf32, #tpu.memory_space<smem>>
    %c0_0 = arith.constant 0 : index
    %c0_1 = arith.constant 0 : index
    %1 = vector.load %arg1[%c0_0, %c0_1] : memref<1x128xf32, #tpu.memory_space<vmem>>, vector<1x128xf32>
    %2 = vector.broadcast %0 : f32 to vector<1x128xf32>
    %3 = arith.mulf %2, %1 : vector<1x128xf32>
    %cst = arith.constant 6.28318548 : f32
    %4 = vector.broadcast %cst : f32 to vector<1x128xf32>
    %5 = arith.mulf %3, %4 : vector<1x128xf32>
    %6 = math.sin %5 : vector<1x128xf32>
    %7 = math.cos %5 : vector<1x128xf32>
    %c0_2 = arith.constant 0 : index
    %c0_3 = arith.constant 0 : index
    %8 = vector.load %arg2[%c0_2, %c0_3] : memref<1x32xf32, #tpu.memory_space<vmem>>, vector<1x32xf32>
    %9 = vector.broadcast %0 : f32 to vector<1x32xf32>
    %10 = arith.mulf %9, %8 : vector<1x32xf32>
    %c0_4 = arith.constant 0 : index
    %c0_5 = arith.constant 0 : index
    %11 = vector.load %arg3[%c0_4, %c0_5] : memref<128x32xf32, #tpu.memory_space<vmem>>, vector<128x32xf32>
    %cst_6 = arith.constant dense<0.000000e+00> : vector<1x32xf32>
    %12 = tpu.matmul %6, %11, %cst_6 {dimension_numbers = #tpu.dot_dimension_numbers<[1], [0], [0], [1], [0, 0, 1, 1], [], []>} : vector<1x128xf32>, vector<128x32xf32>, vector<1x32xf32> -> vector<1x32xf32>
    %13 = arith.addf %10, %12 : vector<1x32xf32>
    %c0_7 = arith.constant 0 : index
    %c0_8 = arith.constant 0 : index
    %14 = vector.load %arg4[%c0_7, %c0_8] : memref<128x32xf32, #tpu.memory_space<vmem>>, vector<128x32xf32>
    %cst_9 = arith.constant dense<0.000000e+00> : vector<1x32xf32>
    %15 = tpu.matmul %7, %14, %cst_9 {dimension_numbers = #tpu.dot_dimension_numbers<[1], [0], [0], [1], [0, 0, 1, 1], [], []>} : vector<1x128xf32>, vector<128x32xf32>, vector<1x32xf32> -> vector<1x32xf32>
    %16 = arith.addf %13, %15 : vector<1x32xf32>
    %c0_10 = arith.constant 0 : index
    %c0_11 = arith.constant 0 : index
    %17 = vector.load %arg5[%c0_10, %c0_11] : memref<1x32xf32, #tpu.memory_space<vmem>>, vector<1x32xf32>
    %18 = arith.addf %16, %17 : vector<1x32xf32>
    %c0_12 = arith.constant 0 : index
    %c0_13 = arith.constant 0 : index
    %c0_14 = arith.constant 0 : index
    %19 = vector.load %arg6[%c0_12, %c0_13, %c0_14] : memref<2x8x32xf32, #tpu.memory_space<vmem>>, vector<2x8x32xf32>
    %c0_15 = arith.constant 0 : index
    %c0_16 = arith.constant 0 : index
    %c0_17 = arith.constant 0 : index
    %20 = vector.load %arg7[%c0_15, %c0_16, %c0_17] : memref<2x8x1xf32, #tpu.memory_space<vmem>>, vector<2x8x1xf32>
    %21 = vector.broadcast %20 : vector<2x8x1xf32> to vector<2x8x32xf32>
    %22 = arith.mulf %19, %21 : vector<2x8x32xf32>
    %cst_18 = arith.constant dense<0.000000e+00> : vector<2x32xf32>
    %23 = vector.multi_reduction <add>, %22, %cst_18 [1] : vector<2x8x32xf32> to vector<2x32xf32>
    %cst_19 = arith.constant dense<0.000000e+00> : vector<2x1xf32>
    %24 = vector.multi_reduction <add>, %20, %cst_19 [1] : vector<2x8x1xf32> to vector<2x1xf32>
    %25 = vector.broadcast %24 : vector<2x1xf32> to vector<2x32xf32>
    %26 = arith.divf %23, %25 : vector<2x32xf32>
    %c0_20 = arith.constant 0 : index
    %c0_21 = arith.constant 0 : index
    %27 = vector.load %arg8[%c0_20, %c0_21] : memref<32x32xf32, #tpu.memory_space<vmem>>, vector<32x32xf32>
    %cst_22 = arith.constant dense<0.000000e+00> : vector<2x32xf32>
    %28 = tpu.matmul %26, %27, %cst_22 {dimension_numbers = #tpu.dot_dimension_numbers<[1], [0], [0], [1], [0, 0, 1, 1], [], []>} : vector<2x32xf32>, vector<32x32xf32>, vector<2x32xf32> -> vector<2x32xf32>
    %c0_23 = arith.constant 0 : index
    %c0_24 = arith.constant 0 : index
    %29 = vector.load %arg9[%c0_23, %c0_24] : memref<1x32xf32, #tpu.memory_space<vmem>>, vector<1x32xf32>
    %30 = vector.broadcast %29 : vector<1x32xf32> to vector<2x32xf32>
    %31 = arith.addf %28, %30 : vector<2x32xf32>
    %cst_25 = arith.constant 0.000000e+00 : f32
    %32 = vector.broadcast %cst_25 : f32 to vector<2x32xf32>
    %33 = arith.maximumf %31, %32 : vector<2x32xf32>
    %cst_26 = arith.constant dense<0.000000e+00> : vector<2x32xf32>
    %34 = vector.multi_reduction <add>, %19, %cst_26 [1] : vector<2x8x32xf32> to vector<2x32xf32>
    %35 = vector.broadcast %18 : vector<1x32xf32> to vector<2x32xf32>
    %36 = arith.addf %34, %35 : vector<2x32xf32>
    %cst_27 = arith.constant 9.000000e+00 : f32
    %37 = vector.broadcast %cst_27 : f32 to vector<2x32xf32>
    %38 = arith.divf %36, %37 : vector<2x32xf32>
    %c0_28 = arith.constant 0 : index
    %c0_29 = arith.constant 0 : index
    %39 = vector.load %arg10[%c0_28, %c0_29] : memref<32x128xf32, #tpu.memory_space<vmem>>, vector<32x128xf32>
    %cst_30 = arith.constant dense<0.000000e+00> : vector<2x128xf32>
    %40 = tpu.matmul %33, %39, %cst_30 {dimension_numbers = #tpu.dot_dimension_numbers<[1], [0], [0], [1], [0, 0, 1, 1], [], []>} : vector<2x32xf32>, vector<32x128xf32>, vector<2x128xf32> -> vector<2x128xf32>
    %c0_31 = arith.constant 0 : index
    %c0_32 = arith.constant 0 : index
    %41 = vector.load %arg11[%c0_31, %c0_32] : memref<32x128xf32, #tpu.memory_space<vmem>>, vector<32x128xf32>
    %cst_33 = arith.constant dense<0.000000e+00> : vector<2x128xf32>
    %42 = tpu.matmul %38, %41, %cst_33 {dimension_numbers = #tpu.dot_dimension_numbers<[1], [0], [0], [1], [0, 0, 1, 1], [], []>} : vector<2x32xf32>, vector<32x128xf32>, vector<2x128xf32> -> vector<2x128xf32>
    %43 = arith.addf %40, %42 : vector<2x128xf32>
    %c0_34 = arith.constant 0 : index
    %c0_35 = arith.constant 0 : index
    %44 = vector.load %arg12[%c0_34, %c0_35] : memref<2x128xf32, #tpu.memory_space<vmem>>, vector<2x128xf32>
    tpu.vector_store %arg12[%c0_34, %c0_35], %43 {strides = array<i32>} : memref<2x128xf32, #tpu.memory_space<vmem>>, vector<2x128xf32>,
    return
  }
}

</mosaic_0001>

<bundles_post_ra>
// kernel: tpu_custom_call.1
= control target key start
LH: loop header
LB: loop body
LE: loop exit
PB: predicated region body
PF: predicated region fallthrough
CT: control target
= control target key end

     0   :  { %vm464_vm0 = vcmask 7168   ;;  %v1059_v3 = vmov 0   ;;  %v1060_v11 = vmov 0.0|0.0   ;;  %vm1061_vm1 = vmmov 0   ;;  %s1376_s0 = inlined_call_operand.<no memory space> [shape: f32[1], index: 0, kind: input, shape index: {}]   ;;  %s1377_s1 = inlined_call_operand.vmem [shape: f32[1,128], index: 1, kind: input, shape index: {}]   ;;  %s1378_s2 = inlined_call_operand.vmem [shape: f32[1,32], index: 2, kind: input, shape index: {}]   ;;  %s1379_s3 = inlined_call_operand.vmem [shape: f32[128,32], index: 3, kind: input, shape index: {}]   ;;  %s1380_s4 = inlined_call_operand.vmem [shape: f32[128,32], index: 4, kind: input, shape index: {}]   ;;  %s1381_s5 = inlined_call_operand.vmem [shape: f32[1,32], index: 5, kind: input, shape index: {}]   ;;  %s1382_s6 = inlined_call_operand.vmem [shape: f32[2,8,32], index: 6, kind: input, shape index: {}]   ;;  %s1383_s7 = inlined_call_operand.vmem [shape: f32[2,8,1], index: 7, kind: input, shape index: {}]   ;;  %s1384_s8 = inlined_call_operand.vmem [shape: f32[32,32], index: 8, kind: input, shape index: {}]   ;;  %s1385_s9 = inlined_call_operand.vmem [shape: f32[1,32], index: 9, kind: input, shape index: {}]   ;;  %s1386_s10 = inlined_call_operand.vmem [shape: f32[32,128], index: 10, kind: input, shape index: {}]   ;;  %s1387_s11 = inlined_call_operand.vmem [shape: f32[32,128], index: 11, kind: input, shape index: {}]   ;;  %s1388_s12 = inlined_call_operand.hbm [shape: f32[2,128], index: 12, kind: output, shape index: {}]  }
   0x1   :  { %v435_v0 = vld [vmem:[%s1383_s7] sm:$0xff]  ;;  %v436_v1 = vld [vmem:[%s1383_s7 + $0x8] sm:$0xff]  ;;  %1025 = vset.pattern.permute.xlu0 %v1059_v3  ;;  %1026 = vset.pattern.permute.xlu1 %v1059_v3  ;;  %v259_v14 = vld [vmem:[%s1379_s3 + $0x10] sm:$0xff]  ;;  %v1062_v38 = vmov 0.0   ;;  %v45_v39 = vstv %s1376_s0 }
   0x2   :  { %v257_v2 = vld [vmem:[%s1379_s3] sm:$0xff]  ;;  %v465_v4 = vsel %vm464_vm0, %v435_v0, 0.0  ;;  %v472_v5 = vsel %vm464_vm0, %v436_v1, 0.0  ;;  %v258_v6 = vld [vmem:[%s1379_s3 + $0x8] sm:$0xff]  ;;  %439 = vperm.xlu0 %1025, %v435_v0   ;;  %942 = vmatprep.subr.bf16.mxu0 %v1060_v11  ;;  %v260_v15 = vld [vmem:[%s1379_s3 + $0x18] sm:$0xff] }
   0x3   :  { %v344_v7 = vld [vmem:[%s1380_s4] sm:$0xff]  ;;  %v345_v8 = vld [vmem:[%s1380_s4 + $0x8] sm:$0xff]  ;;  %v466_v9 = vrot.slane %v465_v4, 4  ;;  %v473_v10 = vrot.slane %v472_v5, 4  ;;  %v943_v12 = vpack.c.bf16 %v258_v6, %v257_v2  ;;  %v346_v16 = vld [vmem:[%s1380_s4 + $0x10] sm:$0xff]  ;;  %966 = vmatprep.subr.bf16.mxu1 %v1060_v11  ;;  %v946_v17 = vpack.c.bf16 %v260_v15, %v259_v14  ;;  %871 = vmatprep.mubr.msk.f32.mxu0 %vm1061_vm1, %v1062_v38 }
   0x4   :  { %v967_v13 = vpack.c.bf16 %v345_v8, %v344_v7  ;;  %v347_v18 = vld [vmem:[%s1380_s4 + $0x18] sm:$0xff]  ;;  %v261_v22 = vld [vmem:[%s1379_s3 + $0x20] sm:$0xff]  ;;  %v262_v23 = vld [vmem:[%s1379_s3 + $0x28] sm:$0xff]  ;;  %906 = vmatprep.mubr.msk.f32.mxu1 %vm1061_vm1, %v1062_v38 }
   0x5   :  { %v467_v19 = vadd.f32 %v466_v9, %v465_v4  ;;  %v474_v20 = vadd.f32 %v473_v10, %v472_v5  ;;  %944 = vmatpush3.bf16.msra.mxu0 %v943_v12  ;;  %v970_v21 = vpack.c.bf16 %v347_v18, %v346_v16  ;;  %v348_v24 = vld [vmem:[%s1380_s4 + $0x20] sm:$0xff]  ;;  %v349_v25 = vld [vmem:[%s1380_s4 + $0x28] sm:$0xff]  ;;  %v949_v28 = vpack.c.bf16 %v262_v23, %v261_v22  ;;  %v263_v32 = vld [vmem:[%s1379_s3 + $0x30] sm:$0xff] }
   0x6   :  { %968 = vmatpush3.bf16.msra.mxu1 %v967_v13  ;;  %945 = vmatprep.subr.bf16.mxu0 %v1060_v11  ;;  %v973_v31 = vpack.c.bf16 %v349_v25, %v348_v24  ;;  %v264_v33 = vld [vmem:[%s1379_s3 + $0x38] sm:$0xff]  ;;  %v350_v34 = vld [vmem:[%s1380_s4 + $0x30] sm:$0xff]  ;;  %v265_v43 = vld [vmem:[%s1379_s3 + $0x40] sm:$0xff] }
   0x7   :  { %969 = vmatprep.subr.bf16.mxu1 %v1060_v11  ;;  %v468_v26 = vrot.slane %v467_v19, 2  ;;  %v475_v27 = vrot.slane %v474_v20, 2  ;;  %444 = vperm.xlu0 %1025, %v436_v1   ;;  %v351_v35 = vld [vmem:[%s1380_s4 + $0x38] sm:$0xff]  ;;  %v952_v41 = vpack.c.bf16 %v264_v33, %v263_v32  ;;  %v44_v44 = vld [vmem:[%s1377_s1] sm:$0x1] }
   0x8   :  { %v976_v42 = vpack.c.bf16 %v351_v35, %v350_v34 }
   0x9   :  { %v476_v29 = vadd.f32 %v475_v27, %v474_v20  ;;  %v469_v30 = vadd.f32 %v468_v26, %v467_v19  ;;  %947 = vmatpush3.bf16.msra.mxu0 %v946_v17 }
   0xa   :  { %971 = vmatpush3.bf16.msra.mxu1 %v970_v21  ;;  %948 = vmatprep.subr.bf16.mxu0 %v1060_v11 }
   0xb   :  { %972 = vmatprep.subr.bf16.mxu1 %v1060_v11  ;;  %v470_v36 = vrot.slane %v469_v30, 1  ;;  %v477_v37 = vrot.slane %v476_v29, 1 }
   0xd   :  { %v471_v40 = vadd.f32 %v470_v36, %v469_v30  ;;  %950 = vmatpush3.bf16.msra.mxu0 %v949_v28 }
   0xe   :  { %974 = vmatpush3.bf16.msra.mxu1 %v973_v31 }
   0xf   :  { %18 = vsyncpa [#allocation4], 0  ;;  %951 = vmatprep.subr.bf16.mxu0 %v1060_v11  ;;  %975 = vmatprep.subr.bf16.mxu1 %v1060_v11  ;;  %v266_v45 = vld [vmem:[%s1379_s3 + $0x48] sm:$0xff]  ;;  %v352_v46 = vld [vmem:[%s1380_s4 + $0x40] sm:$0xff]  ;;  %v46_v48 = vmul.f32 %v45_v39, %v44_v44  ;;  %v478_v49 = vadd.f32 %v477_v37, %v476_v29  ;;  %v1063_v19 = vmov 683565275  }
  0x10   :  { %v353_v47 = vld [vmem:[%s1380_s4 + $0x48] sm:$0xff]  ;;  %481 = vperm.xlu1 %1026, %v471_v40   ;;  %v955_v51 = vpack.c.bf16 %v266_v45, %v265_v43  ;;  %v267_v53 = vld [vmem:[%s1379_s3 + $0x50] sm:$0xff]  ;;  %v268_v54 = vld [vmem:[%s1379_s3 + $0x58] sm:$0xff]  ;;  %v1064_v21 = vmov 2475754826  }
  0x11   :  { %v1223_v50 = vmul.f32 6.2831855, %v46_v48  ;;  %953 = vmatpush3.bf16.msra.mxu0 %v952_v41  ;;  %v979_v52 = vpack.c.bf16 %v353_v47, %v352_v46  ;;  %v354_v55 = vld [vmem:[%s1380_s4 + $0x50] sm:$0xff]  ;;  %v355_v56 = vld [vmem:[%s1380_s4 + $0x58] sm:$0xff]  ;;  %v958_v59 = vpack.c.bf16 %v268_v54, %v267_v53  ;;  %v269_v61 = vld [vmem:[%s1379_s3 + $0x60] sm:$0xff] }
  0x12   :  { %977 = vmatpush3.bf16.msra.mxu1 %v976_v42  ;;  %954 = vmatprep.subr.bf16.mxu0 %v1060_v11  ;;  %v982_v60 = vpack.c.bf16 %v355_v56, %v354_v55  ;;  %v270_v63 = vld [vmem:[%s1379_s3 + $0x68] sm:$0xff]  ;;  %v356_v0 = vld [vmem:[%s1380_s4 + $0x60] sm:$0xff]  ;;  %v271_v6 = vld [vmem:[%s1379_s3 + $0x70] sm:$0xff]  ;;  %v1065_v23 = vmov 2131351028  }
  0x13   :  { %978 = vmatprep.subr.bf16.mxu1 %v1060_v11  ;;  %v51_v57 = vand.u32 2139095040, %v1223_v50  ;;  %v48_v62 = vand.u32 2147483647, %v1223_v50  ;;  %v357_v1 = vld [vmem:[%s1380_s4 + $0x68] sm:$0xff]  ;;  %v961_v4 = vpack.c.bf16 %v270_v63, %v269_v61  ;;  %v272_v8 = vld [vmem:[%s1379_s3 + $0x78] sm:$0xff]  ;;  %v358_v9 = vld [vmem:[%s1380_s4 + $0x70] sm:$0xff] }
  0x14   :  { %486 = vperm.xlu1 %1026, %v478_v49   ;;  %v985_v5 = vpack.c.bf16 %v357_v1, %v356_v0  ;;  %v359_v10 = vld [vmem:[%s1380_s4 + $0x78] sm:$0xff]  ;;  %v964_v14 = vpack.c.bf16 %v272_v8, %v271_v6  ;;  %v1066_v25 = vmov 2102212464   ;;  %v1067_v27 = vmov 920167782  }
  0x15   :  { %v52_v58 = vshrl.u32 %v51_v57, 23  ;;  %956 = vmatpush3.bf16.msra.mxu0 %v955_v51  ;;  %v55_v7 = vand.u32 8388607, %v48_v62  ;;  %v988_v15 = vpack.c.bf16 %v359_v10, %v358_v9  ;;  %v1068_v34 = vmov 1326507024  }
  0x16   :  { %980 = vmatpush3.bf16.msra.mxu1 %v979_v52  ;;  %957 = vmatprep.subr.bf16.mxu0 %v1060_v11  ;;  %vm50_vm9 = vcmp.lt.s32.totalorder %v1223_v50, 0  ;;  %vm49_vm10 = vcmp.le.f32.partialorder %v48_v62, 0.7853982  ;;  %v493_v62 = vld [vmem:[%s1384_s8] sm:$0xff] }
  0x17   :  { %981 = vmatprep.subr.bf16.mxu1 %v1060_v11  ;;  %v778_v2 = vadd.s32 4294967169, %v52_v58  ;;  %v56_v16 = vor.u32 8388608, %v55_v7 }
  0x19   :  { %v58_v3 = vadd.s32 1, %v778_v2  ;;  %959 = vmatpush3.bf16.msra.mxu0 %v958_v59  ;;  %v96_v36 = vshll.u32 %v56_v16, 8 }
  0x1a   :  { %983 = vmatpush3.bf16.msra.mxu1 %v982_v60  ;;  %960 = vmatprep.subr.bf16.mxu0 %v1060_v11 }
  0x1b   :  { %984 = vmatprep.subr.bf16.mxu1 %v1060_v11  ;;  %vm59_vm2 = vcmp.gt.s32.totalorder %v58_v3, 0 }
  0x1c   :  { %v60_v12 = vsel %vm59_vm2, %v58_v3, 0  ;;  %vm140_vm2 = vweird.f32 %v1223_v50 }
  0x1d   :  { %v62_v13 = vand.u32 31, %v60_v12  ;;  %962 = vmatpush3.bf16.msra.mxu0 %v961_v4  ;;  %v61_v17 = vshrl.u32 %v60_v12, 5 }
  0x1e   :  { %986 = vmatpush3.bf16.msra.mxu1 %v985_v5  ;;  %963 = vmatprep.subr.bf16.mxu0 %v1060_v11 }
  0x1f   :  { %987 = vmatprep.subr.bf16.mxu1 %v1060_v11  ;;  %v63_v18 = vsub.s32 32, %v62_v13  ;;  %v65_v20 = vshll.u32 %v1063_v19, %v62_v13  ;;  %v68_v22 = vshll.u32 %v1064_v21, %v62_v13  ;;  %v71_v24 = vshll.u32 %v1065_v23, %v62_v13 }
  0x20   :  { %v74_v26 = vshll.u32 %v1066_v25, %v62_v13  ;;  %v77_v28 = vshll.u32 %v1067_v27, %v62_v13  ;;  %vm80_vm3 = vcmp.lt.s32.totalorder %v61_v17, 1  ;;  %vm83_vm4 = vcmp.lt.s32.totalorder %v61_v17, 4 }
  0x21   :  { %v64_v29 = vshrl.u32 %v1063_v19, %v63_v18  ;;  %v66_v30 = vshrl.u32 %v1064_v21, %v63_v18  ;;  %v69_v31 = vshrl.u32 %v1065_v23, %v63_v18  ;;  %v72_v32 = vshrl.u32 %v1066_v25, %v63_v18  ;;  %965 = vmatpush3.bf16.msra.mxu0 %v964_v14 }
  0x22   :  { %989 = vmatpush3.bf16.msra.mxu1 %v988_v15  ;;  %v75_v33 = vshrl.u32 %v1067_v27, %v63_v18  ;;  %v78_v35 = vshrl.u32 %v1068_v34, %v63_v18  ;;  %990 = vmatprep.subr.bf16.mxu0 %v1060_v11  ;;  %vm81_vm5 = vcmp.lt.s32.totalorder %v61_v17, 2  ;;  %vm82_vm6 = vcmp.lt.s32.totalorder %v61_v17, 3 }
  0x23   :  { %v67_v37 = vor.u32 %v66_v30, %v65_v20  ;;  %v70_v40 = vor.u32 %v69_v31, %v68_v22  ;;  %v73_v41 = vor.u32 %v72_v32, %v71_v24  ;;  %996 = vmatprep.subr.bf16.mxu1 %v1060_v11 }
  0x24   :  { %v76_v42 = vor.u32 %v75_v33, %v74_v26  ;;  %v79_v43 = vor.u32 %v78_v35, %v77_v28 }
  0x25   :  { %v84_v44 = vsel %vm80_vm3, %v64_v29, %v67_v37  ;;  %v85_v45 = vsel %vm83_vm4, %v73_v41, 2102212464  ;;  %v88_v46 = vsel %vm80_vm3, %v67_v37, %v70_v40  ;;  %v92_v47 = vsel %vm80_vm3, %v70_v40, %v73_v41 }
  0x26   :  { %v86_v48 = vsel %vm82_vm6, %v70_v40, %v85_v45  ;;  %v89_v49 = vsel %vm83_vm4, %v76_v42, 920167782  ;;  %v93_v51 = vsel %vm83_vm4, %v79_v43, 1326507024  ;;  %vm449_vm3 = vcmask 261120  }
  0x27   :  { %v90_v52 = vsel %vm82_vm6, %v73_v41, %v89_v49  ;;  %v94_v53 = vsel %vm82_vm6, %v76_v42, %v93_v51  ;;  %v87_v54 = vsel %vm81_vm5, %v84_v44, %v86_v48  ;;  %v496_v48 = vld [vmem:[%s1384_s8 + $0x18] sm:$0xff]  ;;  %vm506_vm4 = vcmask 1041409  }
  0x28   :  { %v91_v55 = vsel %vm81_vm5, %v88_v46, %v90_v52  ;;  %v95_v56 = vsel %vm81_vm5, %v92_v47, %v94_v53  ;;  %v103_v61 = vmul.u32 %v96_v36, %v87_v54  ;;  %v495_v47 = vld [vmem:[%s1384_s8 + $0x10] sm:$0xff]  ;;  %v433_v52 = vld [vmem:[%s1382_s6] sm:$0xff] }
  0x29   :  { %v1275_v57 = vmul.u32.u64.low %v96_v36, %v95_v56  ;;  %v1276_v58 = vmul.u32.u64.high %v96_v36, %v95_v56, %v1275_v57  ;;  %v1278_v59 = vmul.u32.u64.low %v96_v36, %v91_v55  ;;  %v1279_v60 = vmul.u32.u64.high %v96_v36, %v91_v55, %v1278_v59  ;;  %v494_v36 = vld [vmem:[%s1384_s8 + $0x8] sm:$0xff] }
  0x2a   :  { %v991_v44 = vpack.c.bf16 %v494_v36, %v493_v62  ;;  %v434_v55 = vld [vmem:[%s1382_s6 + $0x8] sm:$0xff] }
  0x2b   :  { %vm105_vm7 = vc.u32 %v1276_v58, %v1278_v59  ;;  %v106_v63 = vadd.s32 1, %v1279_v60  ;;  %v104_v10 = vadd.s32 %v1278_v59, %v1276_v58 }
  0x2d   :  { %v107_v0 = vsel %vm105_vm7, %v106_v63, %v1279_v60 }
  0x2e   :  { %v108_v1 = vadd.s32 %v107_v0, %v103_v61 }
  0x30   :  { %v109_v2 = vadd.s32 536870912, %v108_v1 }
  0x32   :  { %v110_v3 = vshrl.u32 %v109_v2, 30 }
  0x34   :  { %v111_v4 = vshll.u32 %v110_v3, 30  ;;  %v134_v23 = vsub.s32 4, %v110_v3 }
  0x36   :  { %v112_v5 = vsub.s32 %v108_v1, %v111_v4  ;;  %v135_v26 = vsel %vm50_vm9, %v134_v23, %v110_v3  ;;  %v581_v23 = vsel %vm449_vm3, %v433_v52, 0.0 }
  0x37   :  { %v137_v29 = vsel %vm49_vm10, 0, %v135_v26 }
  0x38   :  { %v114_v6 = vsub.s32 0, %v112_v5  ;;  %v141_v30 = vadd.s32 3, %v137_v29  ;;  %v245_v32 = vand.u32 3, %v137_v29 }
  0x3a   :  { %v779_v7 = vmin.u32 %v114_v6, %v112_v5  ;;  %v142_v31 = vand.u32 3, %v141_v30  ;;  %vm250_vm12 = vcmp.eq.s32.totalorder %v245_v32, 2  ;;  %vm247_vm14 = vcmp.eq.s32.totalorder %v245_v32, 0 }
  0x3b   :  { %vm246_vm0 = vcmp.lt.s32.totalorder %v245_v32, 2  ;;  %v596_v32 = vlaneseq }
  0x3c   :  { %v116_v8 = vclz %v779_v7  ;;  %vm147_vm11 = vcmp.eq.s32.totalorder %v142_v31, 2  ;;  %vm144_vm13 = vcmp.eq.s32.totalorder %v142_v31, 0  ;;  %vm143_vm15 = vcmp.lt.s32.totalorder %v142_v31, 2  ;;  %v255_v31 = vld [vmem:[%s1378_s2] sm:$0x1] }
  0x3d   :  { %v597_v62 = vshrl.u32 %v596_v32, 7 }
  0x3e   :  { %v780_v9 = vadd.s32 4294967294, %v116_v8 }
  0x40   :  { %vm781_vm8 = vcmp.lt.s32.totalorder %v780_v9, 0 }
  0x41   :  { %v119_v12 = vsel %vm781_vm8, 0, %v780_v9 }
  0x42   :  { %v120_v13 = vsub.s32 32, %v119_v12  ;;  %v121_v14 = vshll.u32 %v112_v5, %v119_v12  ;;  %v124_v15 = vsub.s32 4294967266, %v119_v12 }
  0x44   :  { %v122_v16 = vshrl.u32 %v104_v10, %v120_v13  ;;  %v125_v17 = vadd.s32 127, %v124_v15 }
  0x46   :  { %v123_v18 = vor.u32 %v122_v16, %v121_v14  ;;  %v126_v19 = vshll.u32 %v125_v17, 23  ;;  %v610_v17 = vld [vmem:[%s1387_s11] sm:$0xff] }
  0x48   :  { %v127_v20 = vor.u32 4788187, %v126_v19  ;;  %v130_v21 = vcvt.s32.f32 %v123_v18  ;;  %v611_v18 = vld [vmem:[%s1387_s11 + $0x8] sm:$0xff]  ;;  %v612_v19 = vld [vmem:[%s1387_s11 + $0x10] sm:$0xff] }
  0x4a   :  { %v128_v22 = vand.u32 2147483647, %v127_v20  ;;  %v997_v20 = vpack.c.bf16 %v611_v18, %v610_v17 }
  0x4c   :  { %v131_v24 = vmul.f32 %v130_v21, %v128_v22  ;;  %v613_v21 = vld [vmem:[%s1387_s11 + $0x18] sm:$0xff] }
  0x4d   :  { %v1000_v22 = vpack.c.bf16 %v613_v21, %v612_v19 }
  0x4e   :  { %v132_v25 = vxor.u32 2147483648, %v131_v24 }
  0x50   :  { %v133_v27 = vsel %vm50_vm9, %v132_v25, %v131_v24  ;;  %v588_v24 = vsel %vm449_vm3, %v434_v55, 0.0  ;;  %v582_v25 = vrot.slane %v581_v23, 4 }
  0x51   :  { %v136_v28 = vsel %vm49_vm10, %v1223_v50, %v133_v27  ;;  %v994_v50 = vpack.c.bf16 %v496_v48, %v495_v47  ;;  %v589_v26 = vrot.slane %v588_v24, 4  ;;  %v598_v47 = vsub.s32 0, %v597_v62 }
  0x52   :  { %1027 = vcosq.f32 %v136_v28  ;;  %v583_v27 = vadd.f32 %v582_v25, %v581_v23 }
  0x53   :  { %1029 = vsinq.f32 %v136_v28  ;;  %v590_v28 = vadd.f32 %v589_v26, %v588_v24 }
  0x54   :  { %v584_v29 = vrot.slane %v583_v27, 2 }
  0x55   :  { %v591_v30 = vrot.slane %v590_v28, 2 }
  0x5c   :  { %v1028_v33 = vpop.eup %1027 }
  0x5d   :  { %v1030_v34 = vpop.eup %1029  ;;  %v148_v35 = vxor.u32 2147483648, %v1028_v33 }
  0x5e   :  { %v145_v37 = vxor.u32 2147483648, %v1030_v34 }
  0x5f   :  { %v149_v40 = vsel %vm147_vm11, %v148_v35, %v1030_v34  ;;  %v252_v41 = vsel %vm250_vm12, %v148_v35, %v1030_v34  ;;  %v592_v34 = vadd.f32 %v591_v30, %v590_v28  ;;  %v256_v35 = vmul.f32 %v255_v31, %v45_v39 }
  0x60   :  { %v146_v42 = vsel %vm144_vm13, %v1028_v33, %v145_v37  ;;  %v249_v43 = vsel %vm247_vm14, %v1028_v33, %v145_v37  ;;  %v585_v33 = vadd.f32 %v584_v29, %v583_v27 }
  0x61   :  { %v150_v45 = vsel %vm143_vm15, %v146_v42, %v149_v40  ;;  %v253_v46 = vsel %vm246_vm0, %v249_v43, %v252_v41  ;;  %v593_v41 = vrot.slane %v592_v34, 1 }
  0x62   :  { %v151_v49 = vsel %vm140_vm2, nan, %v150_v45  ;;  %v254_v51 = vsel %vm140_vm2, nan, %v253_v46  ;;  %v586_v40 = vrot.slane %v585_v33, 1  ;;  %v431_v45 = vld [vmem:[%s1381_s5] sm:$0x1] }
  0x63   :  { %872 = vmatmul.mubr.f32.vlgmr.msra.gmra.mrb[0].mxu0 %v151_v49  ;;  %907 = vmatmul.mubr.f32.vlgmr.msra.gmra.mrb[0].mxu1 %v254_v51  ;;  %v594_v49 = vadd.f32 %v593_v41, %v592_v34 }
  0x64   :  { %992 = vmatpush3.bf16.msra.mxu0 %v991_v44  ;;  %917 = vmatprep.mubr.msk.f32.mxu0 %vm1061_vm1, %v1062_v38  ;;  %v587_v48 = vadd.f32 %v586_v40, %v585_v33 }
  0x65   :  { %993 = vmatprep.subr.bf16.mxu0 %v1060_v11  ;;  %928 = vmatprep.mubr.msk.f32.mxu1 %vm1061_vm1, %v1062_v38 }
  0x66   :  { %998 = vmatpush3.bf16.msra.mxu1 %v997_v20 }
  0x67   :  { %999 = vmatprep.subr.bf16.mxu1 %v1060_v11 }
  0x68   :  { %995 = vmatpush3.bf16.msra.mxu0 %v994_v50 }
  0x6a   :  { %1001 = vmatpush3.bf16.msra.mxu1 %v1000_v22 }
  0x6b   :  { %1002 = vmatprep.subr.bf16.mxu1 %v1060_v11 }
  0x81   :  { %v440_v53 = vpop.permute.xlu0 %439 }
  0x82   :  { %v447_v54 = vmul.f32 %v440_v53, %v433_v52  ;;  %v606_v53 = vld [vmem:[%s1386_s10] sm:$0xff] }
  0x84   :  { %v450_v56 = vsel %vm449_vm3, %v447_v54, 0.0  ;;  %v607_v54 = vld [vmem:[%s1386_s10 + $0x8] sm:$0xff] }
  0x85   :  { %v451_v59 = vrot.slane %v450_v56, 4 }
  0x86   :  { %v445_v57 = vpop.permute.xlu0 %444 }
  0x87   :  { %v448_v58 = vmul.f32 %v445_v57, %v434_v55  ;;  %v452_v63 = vadd.f32 %v451_v59, %v450_v56  ;;  %v608_v59 = vld [vmem:[%s1386_s10 + $0x10] sm:$0xff] }
  0x89   :  { %v457_v60 = vsel %vm449_vm3, %v448_v58, 0.0  ;;  %v453_v2 = vrot.slane %v452_v63, 2  ;;  %v1003_v58 = vpack.c.bf16 %v607_v54, %v606_v53 }
  0x8a   :  { %v458_v61 = vrot.slane %v457_v60, 4 }
  0x8b   :  { %v454_v5 = vadd.f32 %v453_v2, %v452_v63 }
  0x8c   :  { %v459_v0 = vadd.f32 %v458_v61, %v457_v60  ;;  %v609_v60 = vld [vmem:[%s1386_s10 + $0x18] sm:$0xff]  ;;  %s1069_s10 = smov [#allocation3]  }
  0x8d   :  { %v455_v7 = vrot.slane %v454_v5, 1  ;;  %v1006_v63 = vpack.c.bf16 %v609_v60, %v608_v59  ;;  %s770_s23 = sshll.u32 %s1069_s10, 4  ;;  %s771_s23 = int_to_ptr.vmem [resolvable:$true] %s770_s23 }
  0x8e   :  { %v460_v3 = vrot.slane %v459_v0, 2  ;;  %s1035_s24 = scalar_lea.vmem %s771_s23, 32  ;;  %p1040_p1 = scmp.lt.s32.totalorder %s771_s23, %s771_s23 }
  0x8f   :  { %v482_v1 = vpop.permute.xlu1 %481  ;;  %v456_v10 = vadd.f32 %v455_v7, %v454_v5  ;;  %p1036_p0 = scmp.ne.s32.totalorder %s771_s23, %s1035_s24  ;;  %p1041_p2 = scmp.lt.s32.totalorder %s1035_s24, %s1035_s24 }
  0x90   :  { %1031 = vrcp.f32 %v482_v1  ;;  %v461_v6 = vadd.f32 %v460_v3, %v459_v0  ;;  %v786_v0 = vld [vmem:[%s1385_s9] ss:$0 sm:$0xff] }
  0x91   :  { %p1042_p3 = por %p1041_p2, %p1040_p1 }
  0x92   :  { %v462_v8 = vrot.slane %v461_v6, 1 }
  0x93   :  { %v487_v4 = vpop.permute.xlu1 %486  ;;  %p1043_p4 = pnand %p1042_p3, %p1036_p0 }
  0x94   :  { %1033 = vrcp.f32 %v487_v4  ;;  %v463_v12 = vadd.f32 %v462_v8, %v461_v6 }
  0x9a   :  { %v1032_v9 = vpop.eup %1031 }
  0x9b   :  { %v490_v14 = vmul.f32 %v1032_v9, %v456_v10 }
  0x9e   :  { %v1034_v13 = vpop.eup %1033 }
  0x9f   :  { %v492_v15 = vmul.f32 %v1034_v13, %v463_v12 }
  0xa1   :  { %v507_v16 = vsel %vm506_vm4, %v492_v15, %v490_v14 }
  0xa2   :  { %918 = vmatmul.mubr.msk.f32.vlgmr.msra.gmra.mrb[2].mxu0 %vm449_vm3, %v507_v16 }
 0x136   :  { %v339_v36 = vpop.f32.mrb[0].mxu0  ;;  %v426_v37 = vpop.f32.mrb[0].mxu1 }
 0x137   :  { %v343_v42 = vadd.f32 %v339_v36, %v256_v35  ;;  %v873_v43 = vpop.f32.mrb[1].mxu0  ;;  %v908_v44 = vpop.f32.mrb[1].mxu1 }
 0x139   :  { %v430_v46 = vadd.f32 %v426_v37, %v343_v42 }
 0x13b   :  { %v432_v51 = vadd.f32 %v431_v45, %v430_v46 }
 0x13d   :  { %v599_v50 = vrot.slane %v432_v51, %v598_v47 }
 0x13f   :  { %v601_v52 = vadd.f32 %v599_v50, %v587_v48  ;;  %v602_v39 = vadd.f32 %v599_v50, %v594_v49 }
 0x141   :  { %v604_v55 = vmul.f32 0.11111111, %v601_v52  ;;  %v605_v56 = vmul.f32 0.11111111, %v602_v39 }
 0x143   :  { %v616_v57 = vrot.slane %v605_v56, 7 }
 0x145   :  { %v617_v61 = vsel %vm506_vm4, %v616_v57, %v604_v55 }
 0x146   :  { %929 = vmatmul.mubr.msk.f32.vlgmr.msra.gmra.mrb[2].mxu1 %vm449_vm3, %v617_v61 }
 0x147   :  { %1004 = vmatpush3.bf16.msra.mxu1 %v1003_v58  ;;  %939 = vmatprep.mubr.msk.f32.mxu1 %vm1061_vm1, %v1062_v38 }
 0x148   :  { %1005 = vmatprep.subr.bf16.mxu1 %v1060_v11 }
 0x14b   :  { %1007 = vmatpush3.bf16.msra.mxu1 %v1006_v63 }
 0x175   :  { %v576_v1 = vpop.f32.mrb[2].mxu0 }
 0x176   :  { %v577_v2 = vadd.f32 %v786_v0, %v576_v1  ;;  %v919_v3 = vpop.f32.mrb[3].mxu0 }
 0x178   :  { %v580_v4 = vmax.f32 %v577_v2, 0.0 }
 0x17a   :  { %940 = vmatmul.mubr.msk.f32.vlgmr.msra.gmra.mrb[2].mxu1 %vm449_vm3, %v580_v4 }
 0x24d   :  { %v759_v5 = vpop.f32.mrb[2].mxu1 }
 0x24e   :  { %763 = vst [vmem:[#allocation3] sm:$0x3] %v759_v5  ;;  %v941_v6 = vpop.f32.mrb[3].mxu1 }
 0x24f   :  { %1046 = shalt.err (!%p1043_p4)
}
 0x250   :  { %s1047_s25 = scalar_lea.hbm %s1388_s12, 32 }
 0x251   :  { %p1048_p5 = scmp.ne.s32.totalorder %s1388_s12, %s1047_s25  ;;  %p1051_p6 = scmp.lt.u32.totalorder %s1047_s25, %s1388_s12 }
 0x253   :  { %p1053_p7 = pnand %p1051_p6, %p1048_p5 }
 0x255   :  { %1056 = shalt.err (!%p1053_p7)
}
 0x256   :  { %773 = dma.vmem_to_hbm [thread:$0]  %s771_s23, 32, %s1388_s12, [#allocation4]  }
 0x257   :  { %1057 = dma.done.wait [#allocation4], 32  }
 0x258   :  { %1058 = vsyncadd [#allocation4], 4294967264 }
 0x259   :  { %777 = vsyncpa [#allocation4], 1 }

</bundles_post_ra>
